<compile_context>
chip_gen: v7x
topology: tpu7x:2x2x1
jax: 0.10.0
libtpu: 0.0.40
codegen_flags: <defaults>
</compile_context>

<pallas_src>
import jax
import jax.numpy as jnp
from jax.experimental import pallas as pl
from jax.experimental.pallas import tpu as pltpu


def _point_conv_bn_relu_kernel(x_ref, w_ref, bias_ref, o_ref, acc_ref):
    # x_ref:    (BT, T_CI, TM)   batch sub-tile, c_in tile, lane-dense spatial tile
    # w_ref:    (T_CO, T_CI)     1x1 conv weight with BN scale folded in
    # bias_ref: (T_CO, 1)        folded BN bias (f32)
    # o_ref:    (BT, T_CO, TM)
    # acc_ref:  (BT, T_CO, TM)   f32 accumulator scratch (resident across k)
    k = pl.program_id(3)

    @pl.when(k == 0)
    def _():
        acc_ref[...] = jnp.zeros_like(acc_ref)

    w = w_ref[...]
    for b in range(x_ref.shape[0]):   # static unroll over the small batch sub-tile
        acc_ref[b] += jnp.dot(
            w, x_ref[b],
            preferred_element_type=jnp.float32,
            precision=jax.lax.Precision.HIGHEST)

    @pl.when(k == pl.num_programs(3) - 1)
    def _():
        y = acc_ref[...] + bias_ref[...]          # (BT,T_CO,TM) + (T_CO,1)
        o_ref[...] = jnp.maximum(y, 0.0).astype(o_ref.dtype)


def _largest_divisor_multiple(total, base, cap):
    """Largest divisor of `total` that is a multiple of `base` and <= cap."""
    best = None
    limit = min(total, cap)
    cand = base
    while cand <= limit:
        if total % cand == 0:
            best = cand
        cand += base
    return best


def _vmem_limit_bytes():
    """Generation-aware VMEM limit (leave headroom for compiler scratch)."""
    cap = None
    try:
        info = pltpu.get_tpu_info()
        cap = getattr(info, "vmem_capacity_bytes", None)
    except Exception:
        cap = None
    if not cap:
        cap = 64 << 20            # conservative fallback: v7x (64 MiB per TC)
    return int(min(cap * 0.70, 96 << 20))


def _choose_tiles(n, c_in, c_out, hw_p, itemsize, vmem_budget):
    """Pick (BT, T_CO, T_CI, TM, single_buffer_weight) from a VMEM byte budget."""
    # --- channel tiles (keep weight/x blocks bounded for huge channel counts)
    if c_in > 2048:
        t_ci = _largest_divisor_multiple(c_in, 128, 2048) or c_in
    else:
        t_ci = c_in
    if c_out > 1024 and c_out % 8 == 0:
        t_co = _largest_divisor_multiple(c_out, 8, 1024) or c_out
    else:
        t_co = c_out

    w_block_bytes = t_co * t_ci * itemsize
    # Single-buffer the weight only when its block index is constant over the
    # whole grid (no c_in / c_out tiling) and it is big enough to matter.
    w_single = (t_ci == c_in and t_co == c_out and w_block_bytes >= (1 << 20))
    w_bufs = 1 if w_single else 2

    def footprint(bt, tm):
        x_b = bt * t_ci * tm * itemsize * 2        # double-buffered input tile
        o_b = bt * t_co * tm * itemsize * 2        # double-buffered output tile
        acc = bt * t_co * tm * 4                   # f32 accumulator scratch
        w_b = w_block_bytes * w_bufs + t_co * 4 * 2
        return x_b + o_b + acc + w_b

    # --- spatial tile: largest 128-multiple divisor of hw_p that fits budget.
    base = hw_p // 128
    tm = 128
    for d in sorted((d for d in range(1, base + 1) if base % d == 0),
                    reverse=True):
        cand = d * 128
        if footprint(1, cand) <= vmem_budget:
            tm = cand
            break

    # --- batch sub-tile: grow while each step still moves < ~2 MiB of HBM,
    # the budget allows it, and >= 2 grid steps remain on a parallel axis
    # (so the v7x megacore keeps both TensorCores busy).
    target_step_bytes = 2 << 20
    other_tiles = (hw_p // tm) * (c_out // t_co)
    bt = 1
    for cand in sorted(d for d in range(2, n + 1) if n % d == 0):
        if footprint(cand, tm) > vmem_budget:
            break
        if bt * (t_ci + t_co) * tm * itemsize >= target_step_bytes:
            break
        if n // cand < 2 and other_tiles < 2:
            break
        bt = cand

    return bt, t_co, t_ci, tm, w_single


def point_conv_forward(x_nchw, conv_weight, gamma, beta, running_mean,
                       running_var, eps=1e-5):
    """Pallas implementation of point_conv.forward (eval-mode BN).

    Args:
      x_nchw:      (N, C_in, H, W)        float32
      conv_weight: (C_out, C_in, 1, 1)    float32 (PyTorch Conv2d layout)
      gamma/beta/running_mean/running_var: (C_out,) float32
    Returns:
      (N, C_out, H, W) float32
    """
    n, c_in, h, w = x_nchw.shape
    c_out = conv_weight.shape[0]
    hw = h * w
    itemsize = jnp.dtype(x_nchw.dtype).itemsize

    # Fold BN (eval) into the weight (scale) and a per-channel bias.
    inv_std = jax.lax.rsqrt(running_var + eps)
    scale = (gamma * inv_std).astype(jnp.float32)
    w_2d = (conv_weight.reshape(c_out, c_in).astype(jnp.float32)
            * scale[:, None]).astype(x_nchw.dtype)                 # (C_out, C_in)
    bias = (beta - running_mean * scale).reshape(c_out, 1).astype(jnp.float32)

    # Lane-dense layout: pure reshape keeps the long spatial axis last.
    x_3d = x_nchw.reshape(n, c_in, hw)

    # Pad H*W up to a multiple of 128 -> unmasked lane-dense stores, and the
    # spatial axis stays tileable instead of becoming one oversized block.
    hw_p = ((hw + 127) // 128) * 128
    if hw_p != hw:
        x_3d = jnp.pad(x_3d, ((0, 0), (0, 0), (0, hw_p - hw)))

    vmem_limit = _vmem_limit_bytes()
    bt, t_co, t_ci, tm, w_single = _choose_tiles(
        n, c_in, c_out, hw_p, itemsize, vmem_budget=vmem_limit // 2)

    grid = (n // bt, c_out // t_co, hw_p // tm, c_in // t_ci)

    if w_single:
        w_spec = pl.BlockSpec((t_co, t_ci), lambda b, co, m, k: (co, k),
                              pipeline_mode=pl.Buffered(1))
    else:
        w_spec = pl.BlockSpec((t_co, t_ci), lambda b, co, m, k: (co, k))

    cost = pl.CostEstimate(
        flops=2 * n * hw_p * c_in * c_out,
        transcendentals=0,
        bytes_accessed=(x_3d.size + w_2d.size + bias.size
                        + n * c_out * hw_p) * itemsize,
    )

    out_3d = pl.pallas_call(
        _point_conv_bn_relu_kernel,
        out_shape=jax.ShapeDtypeStruct((n, c_out, hw_p), x_nchw.dtype),
        grid_spec=pltpu.PrefetchScalarGridSpec(
            num_scalar_prefetch=0,
            grid=grid,
            in_specs=[
                pl.BlockSpec((bt, t_ci, tm), lambda b, co, m, k: (b, k, m)),
                w_spec,
                pl.BlockSpec((t_co, 1), lambda b, co, m, k: (co, 0)),
            ],
            out_specs=pl.BlockSpec((bt, t_co, tm),
                                   lambda b, co, m, k: (b, co, m)),
            scratch_shapes=[pltpu.VMEM((bt, t_co, tm), jnp.float32)],
        ),
        compiler_params=pltpu.CompilerParams(
            dimension_semantics=("parallel", "parallel", "parallel",
                                 "arbitrary"),
            vmem_limit_bytes=vmem_limit,
        ),
        cost_estimate=cost,
    )(x_3d, w_2d, bias)

    return out_3d[:, :, :hw].reshape(n, c_out, h, w)


if __name__ == "__main__":
    def _reference(x, conv_weight, gamma, beta, running_mean, running_var,
                   eps=1e-5):
        c_out, c_in = conv_weight.shape[0], conv_weight.shape[1]
        y = jnp.einsum("nchw,oc->nohw", x, conv_weight.reshape(c_out, c_in),
                       precision=jax.lax.Precision.HIGHEST)
        inv_std = jax.lax.rsqrt(running_var + eps)
        y = (y - running_mean[None, :, None, None]) * \
            (gamma * inv_std)[None, :, None, None] + beta[None, :, None, None]
        return jnp.maximum(y, 0.0)

    def _make_inputs(key, n, c_in, c_out, h, w):
        k_x, k_w, k_g, k_b, k_m, k_v = jax.random.split(key, 6)
        x = jax.random.normal(k_x, (n, c_in, h, w), dtype=jnp.float32)
        conv_weight = jax.random.normal(k_w, (c_out, c_in, 1, 1),
                                        dtype=jnp.float32) * 0.1
        gamma = 1.0 + 0.1 * jax.random.normal(k_g, (c_out,), jnp.float32)
        beta = 0.1 * jax.random.normal(k_b, (c_out,), jnp.float32)
        rm = 0.1 * jax.random.normal(k_m, (c_out,), jnp.float32)
        rv = jnp.abs(1.0 + 0.1 * jax.random.normal(k_v, (c_out,), jnp.float32))
        return x, conv_weight, gamma, beta, rm, rv

    key = jax.random.PRNGKey(0)
    key1, key2 = jax.random.split(key)

    # Case 1: the module's nominal small shape (batch=2, 4->8 channels, 16x16).
    args1 = _make_inputs(key1, 2, 4, 8, 16, 16)
    out1 = jax.block_until_ready(point_conv_forward(*args1))
    ref1 = _reference(*args1)
    assert out1.shape == (2, 8, 16, 16)
    assert jnp.allclose(out1, ref1, atol=1e-4, rtol=1e-4), "mismatch (case 1)"

    # Case 2: H*W not a multiple of 128 (exercises padding) plus batch
    # sub-tiling (N=4, 10x10 spatial).
    args2 = _make_inputs(key2, 4, 4, 8, 10, 10)
    out2 = jax.block_until_ready(point_conv_forward(*args2))
    ref2 = _reference(*args2)
    assert out2.shape == (4, 8, 10, 10)
    assert jnp.allclose(out2, ref2, atol=1e-4, rtol=1e-4), "mismatch (case 2)"

    print("KERNEL_OK")
</pallas_src>

<mosaic_0001>
module attributes {stable_mosaic.version = 11 : i64} {
  func.func @_point_conv_bn_relu_kernel(%arg0: i32, %arg1: i32, %arg2: i32, %arg3: i32, %arg4: memref<1x4x256xf32, #tpu.memory_space<vmem>>, %arg5: memref<8x4xf32, #tpu.memory_space<vmem>>, %arg6: memref<8x1xf32, #tpu.memory_space<vmem>>, %arg7: memref<1x8x256xf32, #tpu.memory_space<vmem>>, %arg8: memref<1x8x256xf32, #tpu.memory_space<vmem>>) attributes {dimension_semantics = [#tpu.dimension_semantics<parallel>, #tpu.dimension_semantics<parallel>, #tpu.dimension_semantics<parallel>, #tpu.dimension_semantics<arbitrary>], iteration_bounds = array<i64: 2, 1, 1, 1>, scalar_prefetch = 0 : i64, scratch_operands = 1 : i64, tpu.core_type = #tpu.core_type<tc>, window_params = [{transform_indices = @transform_0, window_bounds = array<i64: 1, 4, 256>}, {transform_indices = @transform_1, window_bounds = array<i64: 8, 4>}, {transform_indices = @transform_2, window_bounds = array<i64: 8, 1>}, {transform_indices = @transform_3, window_bounds = array<i64: 1, 8, 256>}]} {
    %c0_i32 = arith.constant 0 : i32
    %0 = arith.cmpi eq, %arg3, %c0_i32 : i32
    %1 = arith.extui %0 : i1 to i32
    %c0_i32_0 = arith.constant 0 : i32
    %2 = arith.cmpi ne, %1, %c0_i32_0 : i32
    scf.if %2 {
      %cst_13 = arith.constant 0.000000e+00 : f32
      %16 = vector.broadcast %cst_13 : f32 to vector<1x8x256xf32>
      %c0_14 = arith.constant 0 : index
      %c0_15 = arith.constant 0 : index
      %c0_16 = arith.constant 0 : index
      %17 = vector.load %arg8[%c0_14, %c0_15, %c0_16] : memref<1x8x256xf32, #tpu.memory_space<vmem>>, vector<1x8x256xf32>
      tpu.vector_store %arg8[%c0_14, %c0_15, %c0_16], %16 {strides = array<i32>} : memref<1x8x256xf32, #tpu.memory_space<vmem>>, vector<1x8x256xf32>,
    } else {
    }
    %c0 = arith.constant 0 : index
    %c0_1 = arith.constant 0 : index
    %3 = vector.load %arg5[%c0, %c0_1] : memref<8x4xf32, #tpu.memory_space<vmem>>, vector<8x4xf32>
    %c0_2 = arith.constant 0 : index
    %c0_3 = arith.constant 0 : index
    %c0_4 = arith.constant 0 : index
    %4 = vector.load %arg8[%c0_2, %c0_3, %c0_4] : memref<1x8x256xf32, #tpu.memory_space<vmem>>, vector<1x8x256xf32>
    %5 = vector.shape_cast %4 : vector<1x8x256xf32> to vector<8x256xf32>
    %c0_5 = arith.constant 0 : index
    %c0_6 = arith.constant 0 : index
    %c0_7 = arith.constant 0 : index
    %6 = vector.load %arg4[%c0_5, %c0_6, %c0_7] : memref<1x4x256xf32, #tpu.memory_space<vmem>>, vector<1x4x256xf32>
    %7 = vector.shape_cast %6 : vector<1x4x256xf32> to vector<4x256xf32>
    %cst = arith.constant dense<0.000000e+00> : vector<8x256xf32>
    %8 = tpu.matmul %3, %7, %cst {dimension_numbers = #tpu.dot_dimension_numbers<[1], [0], [0], [1], [0, 0, 1, 1], [], []>, precision = #tpu.contract_precision<fp32>} : vector<8x4xf32>, vector<4x256xf32>, vector<8x256xf32> -> vector<8x256xf32>
    %9 = arith.addf %5, %8 : vector<8x256xf32>
    %c0_8 = arith.constant 0 : index
    %c0_9 = arith.constant 0 : index
    %c0_10 = arith.constant 0 : index
    %10 = vector.load %arg8[%c0_8, %c0_9, %c0_10] : memref<1x8x256xf32, #tpu.memory_space<vmem>>, vector<1x8x256xf32>
    %11 = vector.shape_cast %10 : vector<1x8x256xf32> to vector<8x256xf32>
    %12 = vector.shape_cast %9 : vector<8x256xf32> to vector<1x8x256xf32>
    tpu.vector_store %arg8[%c0_8, %c0_9, %c0_10], %12 {strides = array<i32>} : memref<1x8x256xf32, #tpu.memory_space<vmem>>, vector<1x8x256xf32>,
    %c0_i32_11 = arith.constant 0 : i32
    %13 = arith.cmpi eq, %arg3, %c0_i32_11 : i32
    %14 = arith.extui %13 : i1 to i32
    %c0_i32_12 = arith.constant 0 : i32
    %15 = arith.cmpi ne, %14, %c0_i32_12 : i32
    scf.if %15 {
      %c0_13 = arith.constant 0 : index
      %c0_14 = arith.constant 0 : index
      %c0_15 = arith.constant 0 : index
      %16 = vector.load %arg8[%c0_13, %c0_14, %c0_15] : memref<1x8x256xf32, #tpu.memory_space<vmem>>, vector<1x8x256xf32>
      %c0_16 = arith.constant 0 : index
      %c0_17 = arith.constant 0 : index
      %17 = vector.load %arg6[%c0_16, %c0_17] : memref<8x1xf32, #tpu.memory_space<vmem>>, vector<8x1xf32>
      %18 = vector.shape_cast %17 : vector<8x1xf32> to vector<1x8x1xf32>
      %19 = vector.broadcast %18 : vector<1x8x1xf32> to vector<1x8x256xf32>
      %20 = arith.addf %16, %19 : vector<1x8x256xf32>
      %cst_18 = arith.constant 0.000000e+00 : f32
      %21 = vector.broadcast %cst_18 : f32 to vector<1x8x256xf32>
      %22 = arith.maximumf %20, %21 : vector<1x8x256xf32>
      %c0_19 = arith.constant 0 : index
      %c0_20 = arith.constant 0 : index
      %c0_21 = arith.constant 0 : index
      %23 = vector.load %arg7[%c0_19, %c0_20, %c0_21] : memref<1x8x256xf32, #tpu.memory_space<vmem>>, vector<1x8x256xf32>
      tpu.vector_store %arg7[%c0_19, %c0_20, %c0_21], %22 {strides = array<i32>} : memref<1x8x256xf32, #tpu.memory_space<vmem>>, vector<1x8x256xf32>,
    } else {
    }
    return
  }
  func.func @transform_0(%arg0: i32, %arg1: i32, %arg2: i32, %arg3: i32) -> (i32, i32, i32) {
    %c0_i32 = arith.constant 0 : i32
    return %arg0, %arg3, %arg2 : i32, i32, i32
  }
  func.func @transform_1(%arg0: i32, %arg1: i32, %arg2: i32, %arg3: i32) -> (i32, i32) {
    %c0_i32 = arith.constant 0 : i32
    return %arg1, %arg3 : i32, i32
  }
  func.func @transform_2(%arg0: i32, %arg1: i32, %arg2: i32, %arg3: i32) -> (i32, i32) {
    %c0_i32 = arith.constant 0 : i32
    %c0_i32_0 = arith.constant 0 : i32
    return %arg1, %c0_i32 : i32, i32
  }
  func.func @transform_3(%arg0: i32, %arg1: i32, %arg2: i32, %arg3: i32) -> (i32, i32, i32) {
    %c0_i32 = arith.constant 0 : i32
    return %arg0, %arg1, %arg2 : i32, i32, i32
  }
}

</mosaic_0001>

<bundles_post_ra>
// kernel: tpu_custom_call.1
= control target key start
LH: loop header
LB: loop body
LE: loop exit
PB: predicated region body
PF: predicated region fallthrough
CT: control target
= control target key end

     0   :  { %8 = vsyncpa [#allocation4], 0  ;;  %s1231_s0 = inlined_call_operand.vmem [shape: f32[2,4,256], index: 0, kind: input, shape index: {}]   ;;  %s1232_s1 = inlined_call_operand.vmem [shape: f32[8,4], index: 1, kind: input, shape index: {}]   ;;  %s1233_s2 = inlined_call_operand.vmem [shape: f32[8,1], index: 2, kind: input, shape index: {}]   ;;  %s1234_s3 = inlined_call_operand.hbm [shape: f32[2,8,256], index: 3, kind: output, shape index: {}]  }
   0x1   :  { %10 = vsyncpa [#allocation4 + $0x1], 0  ;;  %s1113_s12 = smov 0   ;;  %s1115_s13 = smov 0  }
   0x2   :  { %s1117_s14 = smov 0   ;;  %s1119_s15 = smov 0  }
   0x3   :  { %s1121_s16 = smov 0   ;;  %s1123_s17 = smov 0  }
   0x4 LB: > { %s924_s18 = sadd.s32 4294967295, %s1088_s17   ;;  %s925_s19 = sadd.s32 4294967294, %s1088_s17   ;;  %s1088_s17 = sphi %s1123_s17, %s16_s17   ;;  %s1084_s16 = sphi %s1121_s16, %s1241_s16   ;;  %s1080_s15 = sphi %s1119_s15, %s1240_s15   ;;  %s1076_s14 = sphi %s1117_s14, %s1239_s14   ;;  %s1072_s13 = sphi %s1115_s13, %s1238_s13   ;;  %s1068_s12 = sphi %s1113_s12, %s1237_s12  }
   0x5   : > { %s42_s20 = sadd.s32 1, %s1084_s16  ;;  %s137_s21 = sadd.s32 1, %s1076_s14 }
   0x6   : > { %p44_p0 = scmp.ge.s32.totalorder %s42_s20, 2  ;;  %p147_p1 = scmp.ne.s32.totalorder %s1076_s14, %s1072_s13 }
   0x7   : > { %p148_p2 = scmp.eq.s32.totalorder %s924_s18, 1  ;;  %p153_p3 = scmp.ne.s32.totalorder %s1072_s13, %s1068_s12 }
   0x8   : > { %s1243_s20 = smov (%p44_p0, %s42_s20), 0  ;;  %p154_p5 = scmp.eq.s32.totalorder %s925_s19, 1 }
   0x9   : > { %p1153_p4 = por %p148_p2, %p147_p1  ;;  %s130_s23 = ssub.s32 %s1084_s16, %s1243_s20 }
   0xa   : > { %p930_p6 = scmp.ge.s32.totalorder %s1088_s17, 1  ;;  %p135_p7 = scmp.eq.s32.totalorder %s130_s23, 0 }
   0xb   : > { %p1160_p8 = por %p154_p5, %p153_p3  ;;  %p206_p9 = scmp.lt.s32.totalorder %s1088_s17, 3 }
   0xc   : > { %s1166_s25 = scalar_select %p135_p7, %s1076_s14, %s137_s21  }
   0xd   : > { %p207_p10 = pnand %p930_p6, %p206_p9 }
   0xe   : > { %p250_p11 = scmp.lt.s32.totalorder (!%p207_p10), %s1080_s15, 1  ;;  %v281_v0 = vld [vmem:[%s1232_s1] sm:$0xff] (!%p207_p10)  ;;  %vm287_vm0 = vcmask (!%p207_p10), 31744   ;;  %v1090_v1 = vmov (!%p207_p10), 0.0   ;;  %v1091_v5 = vmov (!%p207_p10), 0   ;;  %vm291_vm1 = vcmask (!%p207_p10), 1043456  }
   0xf   : > { %210 = sbr.rel (%p207_p10) target bundleno = 283 (0x11b), region = 32  ;;  %362 = vmatprep.mubr.f32.mxu1 (!%p207_p10), %v1090_v1  ;;  %599 = vmatprep.mubr.f32.mxu0 (!%p207_p10), %v1090_v1  ;;  %v289_v2 = vsel (!%p207_p10), %vm287_vm0, %v281_v0, 0  ;;  %v770_v3 = vld [vmem:[%s1233_s2] sm:$0xff] (!%p207_p10)  ;;  %s246_s8 = sand.u32 (!%p207_p10), 1, %s1072_s13  }
  0x10   : > { %v363_v4 = vand.u32 (!%p207_p10), 4294901760, %v289_v2  ;;  %1008 = vset.pattern.permute.xlu0 (!%p207_p10), %v1091_v5  ;;  %s931_s9 = sshll.u32 (!%p207_p10), %s246_s8, 4  ;;  %s940_s10 = sshll.u32 (!%p207_p10), %s1080_s15, 8 }
  0x11   : > { %773 = vperm.xlu0 (!%p207_p10), %1008, %v770_v3   ;;  %s248_s11 = scalar_lea.vmem (!%p207_p10), [#allocation3], %s931_s9  ;;  %s1184_s23 = scalar_lea.hbm (!%p207_p10), %s1234_s3, %s940_s10 }
  0x12   : > { %v364_v6 = vsub.f32 (!%p207_p10), %v289_v2, %v363_v4  ;;  %s801_s18 = sshll.u32 (!%p207_p10), %s248_s11, 4  ;;  %s783_s26 = scalar_lea.sflag (!%p207_p10), [#allocation4], %s246_s8  ;;  %s1186_s18 = int_to_ptr.vmem [resolvable:$true] %s801_s18 }
  0x13   : > { %s1010_s27 = scalar_lea.vmem (!%p207_p10), %s1186_s18, 256 }
  0x14   : > { %v365_v8 = vand.u32 (!%p207_p10), 4294901760, %v364_v6  ;;  %p1011_p12 = scmp.ne.s32.totalorder (!%p207_p10), %s1186_s18, %s1010_s27 }
  0x16   : > { %s251_s30 = scalar_select %p250_p11, %s1080_s15, 1  ;;  %v366_v12 = vsub.f32 %v364_v6, %v365_v8 }
  0x17   : > { %p1012_p13 = pnand %p1011_p12, %p1153_p4  ;;  %s1092_s15 = smov [#allocation3]  }
  0x18   : > { %s939_s4 = sshll.u32 %s251_s30, 3  ;;  %v367_v16 = vand.u32 4294901760, %v366_v12  ;;  %s1014_s28 = sshll.u32 %s1092_s15, 4  ;;  %s1015_s28 = int_to_ptr.vmem [resolvable:$false] %s1014_s28 }
  0x19   : > { %s261_s7 = scalar_lea.vmem %s1231_s0, %s939_s4  ;;  %p1013_p0 = pneg %p1012_p13 }
  0x1a   : > { %v284_v7 = vld [vmem:[%s261_s7] sm:$0xff]  ;;  %s1016_s29 = scalar_lea.vmem %s1015_s28, 512  ;;  %p1017_p1 = scmp.lt.s32.totalorder %s1186_s18, %s1015_s28 }
  0x1b   : > { %v286_v9 = vcombine.high %v284_v7, %v284_v7  ;;  %v292_v10 = vsel %vm291_vm1, %v284_v7, 0  ;;  %p1018_p2 = scmp.lt.s32.totalorder %s1016_s29, %s1010_s27 }
  0x1c   : > { %v298_v11 = vand.u32 4294901760, %v292_v10 }
  0x1d   : > { %v294_v13 = vsel %vm291_vm1, %v286_v9, 0  ;;  %p1019_p3 = por %p1018_p2, %p1017_p1 }
  0x1e   : > { %v296_v14 = vand.u32 4294901760, %v294_v13  ;;  %v381_v15 = vsub.f32 %v292_v10, %v298_v11 }
  0x1f   : > { %p1020_p5 = pnand %p1019_p3, %p1013_p0 }
  0x20   : > { %297 = vmatprep.subr.mxu1 %v296_v14  ;;  %534 = vmatprep.subr.mxu0 %v296_v14  ;;  %v375_v17 = vsub.f32 %v294_v13, %v296_v14  ;;  %v382_v18 = vand.u32 4294901760, %v381_v15 }
  0x21   : > { %299 = vmatpush1.msra.mxu1 %v298_v11  ;;  %536 = vmatpush1.msra.mxu0 %v298_v11 }
  0x22   : > { %368 = vmatmul.mubr.f32.vlgmr.msra.gmra.mrb[0].mxu1 %v367_v16  ;;  %603 = vmatmul.mubr.f32.vlgmr.msra.gmra.mrb[0].mxu0 %v365_v8  ;;  %v376_v19 = vand.u32 4294901760, %v375_v17  ;;  %v383_v20 = vsub.f32 %v381_v15, %v382_v18 }
  0x23   : > { %448 = vmatprep.mubr.f32.mxu1 %v1090_v1  ;;  %679 = vmatprep.mubr.f32.mxu0 %v1090_v1 }
  0x24   : > { %v377_v21 = vsub.f32 %v375_v17, %v376_v19  ;;  %612 = vmatprep.subr.mxu0 %v376_v19  ;;  %v384_v22 = vand.u32 4294901760, %v383_v20 }
  0x25   : > { %616 = vmatpush1.msra.mxu0 %v382_v18 }
  0x26   : > { %v378_v23 = vand.u32 4294901760, %v377_v21  ;;  %688 = vmatprep.subr.mxu0 %v296_v14 }
  0x28   : > { %379 = vmatprep.subr.mxu1 %v378_v23 }
  0x29   : > { %385 = vmatpush1.msra.mxu1 %v384_v22 }
  0x2a   : > { %450 = vmatmul.mubr.f32.vlgmr.msra.gmra.mrb[0].mxu1 %v363_v4  ;;  %681 = vmatmul.mubr.f32.vlgmr.msra.gmra.mrb[0].mxu0 %v363_v4 }
  0x2b   : > { %458 = vmatprep.subr.mxu1 %v375_v17  ;;  %524 = vmatprep.mubr.f32.mxu1 %v1090_v1 }
  0x2c   : > { %461 = vmatpush1.msra.mxu1 %v381_v15  ;;  %690 = vmatpush1.msra.mxu0 %v298_v11 }
  0x2d   : > { %753 = vmatprep.mubr.f32.mxu0 %v1090_v1 }
  0x32   : > { %527 = vmatmul.mubr.f32.vlgmr.msra.gmra.mrb[0].mxu1 %v364_v6  ;;  %755 = vmatmul.mubr.f32.vlgmr.msra.gmra.mrb[0].mxu0 %v363_v4 }
  0x90   : > { %v774_v24 = vpop.permute.xlu0 %773 }
 0x105   : > { %v528_v25 = vpop.f32.mrb[0].mxu1  ;;  %v756_v26 = vpop.f32.mrb[0].mxu0 }
 0x106   : > { %v941_v27 = vadd.f32 %v756_v26, %v528_v25  ;;  %v530_v28 = vpop.f32.mrb[1].mxu1  ;;  %v758_v29 = vpop.f32.mrb[1].mxu0 }
 0x107   : > { %v942_v30 = vadd.f32 %v758_v29, %v530_v28 }
 0x108   : > { %v776_v31 = vadd.f32 %v941_v27, %v774_v24 }
 0x109   : > { %v777_v32 = vadd.f32 %v942_v30, %v774_v24 }
 0x10a   : > { %v778_v33 = vmax.f32 %v776_v31, 0.0 }
 0x10b   : > { %v779_v34 = vmax.f32 %v777_v32, 0.0 }
 0x10c   : > { %780 = vst [vmem:[%s248_s11] sm:$0xff] %v778_v33 }
 0x10d   : > { %781 = vst [vmem:[%s248_s11 + $0x8] sm:$0xff] %v779_v34 }
 0x10e   : > { %1023 = shalt.err (!%p1020_p5)
}
 0x10f   : > { %s1024_s30 = scalar_lea.hbm %s1184_s23, 256  ;;  %s1028_s6 = scalar_lea.hbm %s1234_s3, 512 }
 0x110   : > { %p1025_p6 = scmp.ne.s32.totalorder %s1184_s23, %s1024_s30  ;;  %p1029_p10 = scmp.lt.u32.totalorder %s1184_s23, %s1234_s3 }
 0x111   : > { %p1030_p11 = scmp.lt.u32.totalorder %s1028_s6, %s1024_s30  ;;  %p1032_p13 = scmp.lt.u32.totalorder %s1024_s30, %s1184_s23 }
 0x112   : > { %p1026_p7 = pnand %p1025_p6, %p1153_p4 }
 0x113   : > { %p1031_p12 = por %p1030_p11, %p1029_p10 }
 0x114   : > { %p1027_p9 = pneg %p1026_p7 }
 0x115   : > { %p1033_p0 = por %p1032_p13, %p1031_p12 }
 0x117   : > { %p1034_p1 = pnand %p1033_p0, %p1027_p9 }
 0x119   : > { %1037 = shalt.err (!%p1034_p1)
}
 0x11a   : > { %951 = dma.vmem_to_hbm [thread:$0]  (%p1153_p4), %s1186_s18, 256, %s1184_s23, %s783_s26  }
 0x11b PF: > { %p957_p2 = scmp.ge.s32.totalorder %s1088_s17, 2  ;;  %s813_s9 = sand.u32 1, %s1068_s12  }
 0x11c   : > { %s814_s10 = scalar_lea.sflag [#allocation4], %s813_s9 }
 0x11d   : > { %p954_p3 = pnand %p957_p2, %p1160_p8 }
 0x11f   : > { %1063 = dma.done.wait (!%p954_p3), %s814_s10, 256  }
 0x120   : > { %1065 = vsyncadd (!%p954_p3), %s814_s10, 4294967040  ;;  %s16_s17 = sadd.s32 1, %s1088_s17   ;;  %s1237_s12 = smov %s1072_s13 }
 0x121   : > { %p13_p5 = scmp.ge.s32.totalorder %s16_s17, 4   ;;  %s1238_s13 = smov %s1076_s14 }
 0x122   : > { %s1239_s14 = smov %s1166_s25  ;;  %s1240_s15 = smov %s1084_s16 }
 0x123   : > { %s1241_s16 = smov %s1243_s20  ;;  %15 = sbr.rel (!%p13_p5) target bundleno = 4 (0x4), region = 81 }
 0x12a   :  { %819 = vsyncpa [#allocation4], 1 }
 0x12b   :  { %821 = vsyncpa [#allocation4 + $0x1], 1 }

</bundles_post_ra>
